<compile_context>
chip_gen: v7x
topology: tpu7x:2x2x1
jax: 0.10.0
libtpu: 0.0.40
codegen_flags: <defaults>
</compile_context>

<pallas_src>
import jax
import jax.numpy as jnp
from jax.experimental import pallas as pl
from jax.experimental.pallas import tpu as pltpu


def _round_up(x, m):
    return (x + m - 1) // m * m


def _sublane_multiple(dtype):
    itemsize = jnp.dtype(dtype).itemsize
    return 8 * max(1, 4 // itemsize)


def _block_vmem_bytes(shape, dtype, buffers):
    """Approx VMEM footprint of one pipelined block, incl. (sublane,128) padding."""
    itemsize = jnp.dtype(dtype).itemsize
    if len(shape) == 0:
        elems = 1
    elif len(shape) == 1:
        elems = _round_up(int(shape[0]), 128)
    else:
        lead = 1
        for s in shape[:-2]:
            lead *= int(s)
        elems = (lead
                 * _round_up(int(shape[-2]), _sublane_multiple(dtype))
                 * _round_up(int(shape[-1]), 128))
    return elems * itemsize * buffers


def _tpu_info():
    try:
        return pltpu.get_tpu_info()
    except Exception:
        return None


def _vmem_capacity_bytes():
    info = _tpu_info()
    cap = getattr(info, "vmem_capacity_bytes", None) if info is not None else None
    if not isinstance(cap, int) or cap <= 0:
        cap = 64 * 1024 * 1024  # conservative default = v7x per-TC VMEM
    return cap


def _num_tensorcores():
    info = _tpu_info()
    if info is None:
        return 1
    for attr in ("num_cores", "num_cores_per_chip", "cores_per_chip",
                 "num_tensorcores", "tensorcore_count"):
        v = getattr(info, attr, None)
        if isinstance(v, int) and v > 0:
            return v
    return 1


# ----------------------------------------------------------------------------
# Kernel 1: fused-experts kernel (grid = token tiles only).
#   All expert weights resident in VMEM once (single-buffered); experts are
#   fused into two wide MXU matmuls.
# ----------------------------------------------------------------------------
def moe_fused_kernel(gate_ref, x_ref, w1c_ref, b1c_ref, w2s_ref, b2m_ref,
                     out_ref):
    num_experts = gate_ref.shape[1]
    d_out = out_ref.shape[1]

    x = x_ref[...]                                      # (tm, D_in_p) bf16
    gate = gate_ref[...]                                # (tm, E) f32

    # First layer of every expert at once: (tm, D_in_p) @ (D_in_p, E*D_out_p).
    h = jnp.dot(x, w1c_ref[...], preferred_element_type=jnp.float32)
    h = jnp.maximum(h + b1c_ref[...], 0.0)              # (tm, E*D_out_p) f32

    # Scale each expert's D_out_p-wide lane block by its gate weight (static,
    # lane-aligned slices), then one wide second matmul.
    parts = [h[:, e * d_out:(e + 1) * d_out] * gate[:, e:e + 1]
             for e in range(num_experts)]
    h_scaled = jnp.concatenate(parts, axis=1).astype(w2s_ref.dtype)

    y = jnp.dot(h_scaled, w2s_ref[...], preferred_element_type=jnp.float32)
    # sum_e g_e * b2_e as a tiny (tm, E) @ (E, D_out_p) matmul.
    y = y + jnp.dot(gate, b2m_ref[...], preferred_element_type=jnp.float32)
    out_ref[...] = y.astype(out_ref.dtype)


# ----------------------------------------------------------------------------
# Kernel 2: expert-grid kernel (grid = (token_tiles, experts, hidden_tiles)).
#   Weights streamed as (D_in_p, tk) / (tk, D_out_p) tiles; two resident f32
#   accumulators (per-expert partial, and gated total).
# ----------------------------------------------------------------------------
def moe_expert_grid_kernel(gate_ref, x_ref, w1_ref, b1_ref, w2_ref, b2_ref,
                           out_ref, y_acc_ref, acc_ref):
    e = pl.program_id(1)
    k = pl.program_id(2)
    n_e = pl.num_programs(1)
    n_k = pl.num_programs(2)

    @pl.when(jnp.logical_and(e == 0, k == 0))
    def _():
        acc_ref[...] = jnp.zeros_like(acc_ref)

    @pl.when(k == 0)
    def _():
        y_acc_ref[...] = jnp.zeros_like(y_acc_ref)

    h = jnp.dot(x_ref[...], w1_ref[...], preferred_element_type=jnp.float32)
    h = jnp.maximum(h + b1_ref[...], 0.0)               # (tm, tk) f32
    y_acc_ref[...] += jnp.dot(h.astype(w2_ref.dtype), w2_ref[...],
                              preferred_element_type=jnp.float32)

    @pl.when(k == n_k - 1)
    def _():
        acc_ref[...] += gate_ref[...] * (y_acc_ref[...] + b2_ref[...])

    @pl.when(jnp.logical_and(e == n_e - 1, k == n_k - 1))
    def _():
        out_ref[...] = acc_ref[...].astype(out_ref.dtype)


# ----------------------------------------------------------------------------
# Wrapper
# ----------------------------------------------------------------------------
def moe_forward(x, wg, bg, w1, b1, w2, b2, *, tm=None, force_expert_grid=False):
    """x: (B, S, D_in). Weights in (in, out) layout (transposed vs. nn.Linear).

    wg: (D_in, E), bg: (1, E)
    w1: (E, D_in, D_out), b1: (E, 1, D_out)
    w2: (E, D_out, D_out), b2: (E, 1, D_out)
    returns (B, S, D_out)
    """
    B, S, D_in = x.shape
    E, _, D_out = w1.shape
    N = B * S

    D_in_p = _round_up(D_in, 128)
    D_out_p = _round_up(D_out, 128)
    EDo = E * D_out_p

    out_dtype = x.dtype
    vmem_cap = _vmem_capacity_bytes()
    num_cores = _num_tensorcores()
    # Generation-aware resident-block budget (~48 MiB v7x, ~96 MiB v5e/v6e).
    budget = int(0.75 * vmem_cap)

    def _pick_tm(target):
        t = target if tm is None else tm
        t = max(16, _round_up(min(t, _round_up(N, 16)), 16))
        # Shrink for >= num_cores token tiles only on multi-TensorCore chips.
        if tm is None and num_cores >= 2:
            while t > 16 and pl.cdiv(N, t) < num_cores:
                t //= 2
            t = max(16, _round_up(t, 16))
        return t

    # ---- gating hoisted out of the kernel (computed once, in f32) ----------
    x_flat = x.reshape(N, D_in).astype(jnp.float32)
    gate = jax.nn.softmax(
        x_flat @ wg.astype(jnp.float32) + bg.astype(jnp.float32), axis=-1)  # (N,E)

    # ---- fused-path VMEM accounting (all resident blocks, not just weights) -
    tm_fused = _pick_tm(256)
    fused_bytes = (
        _block_vmem_bytes((tm_fused, E), jnp.float32, 2)          # gate
        + _block_vmem_bytes((tm_fused, D_in_p), jnp.bfloat16, 2)  # x
        + _block_vmem_bytes((D_in_p, EDo), jnp.bfloat16, 1)       # w1_cat (1-buf)
        + _block_vmem_bytes((1, EDo), jnp.float32, 1)             # b1_cat (1-buf)
        + _block_vmem_bytes((EDo, D_out_p), jnp.bfloat16, 1)      # w2_stack (1-buf)
        + _block_vmem_bytes((E, D_out_p), jnp.float32, 1)         # b2_mat (1-buf)
        + _block_vmem_bytes((tm_fused, D_out_p), out_dtype, 2)    # out
        + _block_vmem_bytes((tm_fused, EDo), jnp.float32, 1)      # h (intermediate)
        + _block_vmem_bytes((tm_fused, EDo), jnp.bfloat16, 1)     # h_scaled
    )
    use_fused = (not force_expert_grid) and fused_bytes <= budget

    if use_fused:
        tm_ = tm_fused
        N_pad = _round_up(N, tm_)
        num_tiles = N_pad // tm_

        x_p = jnp.pad(x_flat, ((0, N_pad - N), (0, D_in_p - D_in))
                      ).astype(jnp.bfloat16)
        gate_p = jnp.pad(gate, ((0, N_pad - N), (0, 0)))          # (N_pad, E) f32

        w1_pad = jnp.pad(w1, ((0, 0), (0, D_in_p - D_in), (0, D_out_p - D_out)))
        w2_pad = jnp.pad(w2, ((0, 0), (0, D_out_p - D_out), (0, D_out_p - D_out)))
        w1_cat = jnp.transpose(w1_pad, (1, 0, 2)).reshape(D_in_p, EDo
                                                          ).astype(jnp.bfloat16)
        w2_stack = w2_pad.reshape(EDo, D_out_p).astype(jnp.bfloat16)
        b1_cat = jnp.pad(b1, ((0, 0), (0, 0), (0, D_out_p - D_out))
                         ).reshape(1, EDo).astype(jnp.float32)
        b2_mat = jnp.pad(b2, ((0, 0), (0, 0), (0, D_out_p - D_out))
                         ).reshape(E, D_out_p).astype(jnp.float32)

        vmem_limit = int(min(vmem_cap * 9 // 10,
                             max(fused_bytes + (4 << 20), 32 << 20)))

        def _run_fused(single_buffer_consts):
            const_kw = ({"pipeline_mode": pl.Buffered(1)}
                        if single_buffer_consts else {})
            return pl.pallas_call(
                moe_fused_kernel,
                out_shape=jax.ShapeDtypeStruct((N_pad, D_out_p), out_dtype),
                grid_spec=pltpu.PrefetchScalarGridSpec(
                    num_scalar_prefetch=0,
                    grid=(num_tiles,),
                    in_specs=[
                        pl.BlockSpec((tm_, E), lambda i: (i, 0)),            # gate
                        pl.BlockSpec((tm_, D_in_p), lambda i: (i, 0)),       # x
                        pl.BlockSpec((D_in_p, EDo), lambda i: (0, 0),
                                     **const_kw),                            # w1_cat
                        pl.BlockSpec((1, EDo), lambda i: (0, 0),
                                     **const_kw),                            # b1_cat
                        pl.BlockSpec((EDo, D_out_p), lambda i: (0, 0),
                                     **const_kw),                            # w2_stack
                        pl.BlockSpec((E, D_out_p), lambda i: (0, 0),
                                     **const_kw),                            # b2_mat
                    ],
                    out_specs=pl.BlockSpec((tm_, D_out_p), lambda i: (i, 0)),
                ),
                compiler_params=pltpu.CompilerParams(
                    dimension_semantics=("parallel",),
                    vmem_limit_bytes=vmem_limit),
            )(gate_p, x_p, w1_cat, b1_cat, w2_stack, b2_mat)

        try:
            out = _run_fused(True)
        except Exception:
            # Fallback if single-buffered constant blocks are rejected.
            out = _run_fused(False)

    else:
        # ---- expert-grid path: grid = (token_tiles, experts, hidden_tiles) --
        tm_target = 1024 if vmem_cap >= (96 << 20) else 512
        tm_ = _pick_tm(tm_target)

        # Hidden-dim tile tk: largest multiple of 128 that divides D_out_p,
        # capped at 512.
        units = D_out_p // 128
        tk_units = 1
        for cand in (4, 2, 1):
            if cand <= units and units % cand == 0:
                tk_units = cand
                break
        tk = tk_units * 128

        def _grid_bytes(t_m, t_k):
            return (
                _block_vmem_bytes((t_m, 1), jnp.float32, 2)           # gate_e
                + _block_vmem_bytes((t_m, D_in_p), jnp.bfloat16, 2)   # x
                + _block_vmem_bytes((D_in_p, t_k), jnp.bfloat16, 2)   # w1 tile
                + _block_vmem_bytes((1, t_k), jnp.float32, 2)         # b1 tile
                + _block_vmem_bytes((t_k, D_out_p), jnp.bfloat16, 2)  # w2 tile
                + _block_vmem_bytes((1, D_out_p), jnp.float32, 2)     # b2
                + _block_vmem_bytes((t_m, D_out_p), out_dtype, 2)     # out
                + _block_vmem_bytes((t_m, D_out_p), jnp.float32, 1)   # y_acc
                + _block_vmem_bytes((t_m, D_out_p), jnp.float32, 1)   # acc
                + _block_vmem_bytes((t_m, t_k), jnp.float32, 1)       # h
            )

        while _grid_bytes(tm_, tk) > budget and tm_ > 64:
            tm_ = max(64, tm_ // 2)
        while _grid_bytes(tm_, tk) > budget and tk > 128:
            tk = max(128, tk // 2)

        N_pad = _round_up(N, tm_)
        num_tiles = N_pad // tm_
        n_k = D_out_p // tk

        x_p = jnp.pad(x_flat, ((0, N_pad - N), (0, D_in_p - D_in))
                      ).astype(jnp.bfloat16)
        gate_pe = jnp.transpose(jnp.pad(gate, ((0, N_pad - N), (0, 0))),
                                (1, 0))[:, :, None]               # (E, N_pad, 1)
        w1_p = jnp.pad(w1, ((0, 0), (0, D_in_p - D_in), (0, D_out_p - D_out))
                       ).astype(jnp.bfloat16)
        w2_p = jnp.pad(w2, ((0, 0), (0, D_out_p - D_out), (0, D_out_p - D_out))
                       ).astype(jnp.bfloat16)
        b1_p = jnp.pad(b1, ((0, 0), (0, 0), (0, D_out_p - D_out))
                       ).astype(jnp.float32)
        b2_p = jnp.pad(b2, ((0, 0), (0, 0), (0, D_out_p - D_out))
                       ).astype(jnp.float32)

        vmem_limit = int(min(vmem_cap * 9 // 10,
                             max(_grid_bytes(tm_, tk) + (4 << 20), 32 << 20)))

        out = pl.pallas_call(
            moe_expert_grid_kernel,
            out_shape=jax.ShapeDtypeStruct((N_pad, D_out_p), out_dtype),
            grid_spec=pltpu.PrefetchScalarGridSpec(
                num_scalar_prefetch=0,
                grid=(num_tiles, E, n_k),
                in_specs=[
                    pl.BlockSpec((None, tm_, 1), lambda i, e, k: (e, i, 0)),      # gate_e
                    pl.BlockSpec((tm_, D_in_p), lambda i, e, k: (i, 0)),          # x
                    pl.BlockSpec((None, D_in_p, tk), lambda i, e, k: (e, 0, k)),  # w1 tile
                    pl.BlockSpec((None, 1, tk), lambda i, e, k: (e, 0, k)),       # b1 tile
                    pl.BlockSpec((None, tk, D_out_p), lambda i, e, k: (e, k, 0)), # w2 tile
                    pl.BlockSpec((None, 1, D_out_p), lambda i, e, k: (e, 0, 0)),  # b2
                ],
                out_specs=pl.BlockSpec((tm_, D_out_p), lambda i, e, k: (i, 0)),
                scratch_shapes=[pltpu.VMEM((tm_, D_out_p), jnp.float32),
                                pltpu.VMEM((tm_, D_out_p), jnp.float32)],
            ),
            compiler_params=pltpu.CompilerParams(
                dimension_semantics=("parallel", "arbitrary", "arbitrary"),
                vmem_limit_bytes=vmem_limit),
        )(gate_pe, x_p, w1_p, b1_p, w2_p, b2_p)

    # Strip token / feature padding.
    return out[:N, :D_out].reshape(B, S, D_out)


# ----------------------------------------------------------------------------
# Pure-JAX reference (f32)
# ----------------------------------------------------------------------------
def moe_reference(x, wg, bg, w1, b1, w2, b2):
    B, S, D_in = x.shape
    E = wg.shape[1]
    xf = x.reshape(-1, D_in)
    gate = jax.nn.softmax(xf @ wg + bg, axis=-1)              # (N, E)
    outs = []
    for e in range(E):
        h = jnp.maximum(xf @ w1[e] + b1[e], 0.0)
        outs.append(h @ w2[e] + b2[e])
    expert_out = jnp.stack(outs, axis=1)                      # (N, E, D_out)
    y = jnp.sum(gate[..., None] * expert_out, axis=1)
    return y.reshape(B, S, -1)


if __name__ == "__main__":
    # Small shapes consistent with the module's forward: (batch, seq, dim)
    B, S, D_in, D_out, E = 2, 8, 32, 32, 4

    key = jax.random.PRNGKey(0)
    ks = jax.random.split(key, 7)

    x = jax.random.normal(ks[0], (B, S, D_in), dtype=jnp.float32)

    # Parameters stored in (in, out) layout (transposed vs. torch nn.Linear).
    scale = 0.1
    wg = scale * jax.random.normal(ks[1], (D_in, E), dtype=jnp.float32)
    bg = scale * jax.random.normal(ks[2], (1, E), dtype=jnp.float32)
    w1 = scale * jax.random.normal(ks[3], (E, D_in, D_out), dtype=jnp.float32)
    b1 = scale * jax.random.normal(ks[4], (E, 1, D_out), dtype=jnp.float32)
    w2 = scale * jax.random.normal(ks[5], (E, D_out, D_out), dtype=jnp.float32)
    b2 = scale * jax.random.normal(ks[6], (E, 1, D_out), dtype=jnp.float32)

    ref = moe_reference(x, wg, bg, w1, b1, w2, b2)

    # Fused-experts path (auto-selected at this size).
    out_fused = jax.block_until_ready(moe_forward(x, wg, bg, w1, b1, w2, b2))
    assert out_fused.shape == (B, S, D_out), out_fused.shape
    # bf16 MXU operands with f32 accumulation -> loosened tolerance.
    assert jnp.allclose(out_fused, ref, atol=3e-2, rtol=3e-2), (
        float(jnp.max(jnp.abs(out_fused - ref))))

    # Expert-grid path (fallback for large expert weight sets) — exercised too.
    out_grid = jax.block_until_ready(
        moe_forward(x, wg, bg, w1, b1, w2, b2, force_expert_grid=True))
    assert out_grid.shape == (B, S, D_out), out_grid.shape
    assert jnp.allclose(out_grid, ref, atol=3e-2, rtol=3e-2), (
        float(jnp.max(jnp.abs(out_grid - ref))))

    print("KERNEL_OK")
</pallas_src>

<mosaic_0001>
module attributes {stable_mosaic.version = 11 : i64} {
  func.func @moe_fused_kernel(%arg0: i32, %arg1: memref<16x4xf32, #tpu.memory_space<vmem>>, %arg2: memref<16x128xbf16, #tpu.memory_space<vmem>>, %arg3: memref<128x512xbf16, #tpu.memory_space<vmem>>, %arg4: memref<1x512xf32, #tpu.memory_space<vmem>>, %arg5: memref<512x128xbf16, #tpu.memory_space<vmem>>, %arg6: memref<4x128xf32, #tpu.memory_space<vmem>>, %arg7: memref<16x128xf32, #tpu.memory_space<vmem>>) attributes {dimension_semantics = [#tpu.dimension_semantics<parallel>], iteration_bounds = array<i64: 1>, scalar_prefetch = 0 : i64, scratch_operands = 0 : i64, tpu.core_type = #tpu.core_type<tc>, window_params = [{transform_indices = @transform_0, window_bounds = array<i64: 16, 4>}, {transform_indices = @transform_1, window_bounds = array<i64: 16, 128>}, {pipeline_mode = #tpu.pipeline_mode<synchronous>, transform_indices = @transform_2, window_bounds = array<i64: 128, 512>}, {pipeline_mode = #tpu.pipeline_mode<synchronous>, transform_indices = @transform_3, window_bounds = array<i64: 1, 512>}, {pipeline_mode = #tpu.pipeline_mode<synchronous>, transform_indices = @transform_4, window_bounds = array<i64: 512, 128>}, {pipeline_mode = #tpu.pipeline_mode<synchronous>, transform_indices = @transform_5, window_bounds = array<i64: 4, 128>}, {transform_indices = @transform_6, window_bounds = array<i64: 16, 128>}]} {
    %c0 = arith.constant 0 : index
    %c0_0 = arith.constant 0 : index
    %0 = vector.load %arg2[%c0, %c0_0] : memref<16x128xbf16, #tpu.memory_space<vmem>>, vector<16x128xbf16>
    %c0_1 = arith.constant 0 : index
    %c0_2 = arith.constant 0 : index
    %1 = vector.load %arg1[%c0_1, %c0_2] : memref<16x4xf32, #tpu.memory_space<vmem>>, vector<16x4xf32>
    %c0_3 = arith.constant 0 : index
    %c0_4 = arith.constant 0 : index
    %2 = vector.load %arg3[%c0_3, %c0_4] : memref<128x512xbf16, #tpu.memory_space<vmem>>, vector<128x512xbf16>
    %cst = arith.constant dense<0.000000e+00> : vector<16x512xf32>
    %3 = tpu.matmul %0, %2, %cst {dimension_numbers = #tpu.dot_dimension_numbers<[1], [0], [0], [1], [0, 0, 1, 1], [], []>} : vector<16x128xbf16>, vector<128x512xbf16>, vector<16x512xf32> -> vector<16x512xf32>
    %c0_5 = arith.constant 0 : index
    %c0_6 = arith.constant 0 : index
    %4 = vector.load %arg4[%c0_5, %c0_6] : memref<1x512xf32, #tpu.memory_space<vmem>>, vector<1x512xf32>
    %5 = vector.broadcast %4 : vector<1x512xf32> to vector<16x512xf32>
    %6 = arith.addf %3, %5 : vector<16x512xf32>
    %cst_7 = arith.constant 0.000000e+00 : f32
    %7 = vector.broadcast %cst_7 : f32 to vector<16x512xf32>
    %8 = arith.maximumf %6, %7 : vector<16x512xf32>
    %9 = vector.extract_strided_slice %8 {offsets = [0, 0], sizes = [16, 128], strides = [1, 1]} : vector<16x512xf32> to vector<16x128xf32>
    %10 = vector.extract_strided_slice %1 {offsets = [0, 0], sizes = [16, 1], strides = [1, 1]} : vector<16x4xf32> to vector<16x1xf32>
    %11 = vector.broadcast %10 : vector<16x1xf32> to vector<16x128xf32>
    %12 = arith.mulf %9, %11 : vector<16x128xf32>
    %13 = vector.extract_strided_slice %8 {offsets = [0, 128], sizes = [16, 128], strides = [1, 1]} : vector<16x512xf32> to vector<16x128xf32>
    %14 = vector.extract_strided_slice %1 {offsets = [0, 1], sizes = [16, 1], strides = [1, 1]} : vector<16x4xf32> to vector<16x1xf32>
    %15 = vector.broadcast %14 : vector<16x1xf32> to vector<16x128xf32>
    %16 = arith.mulf %13, %15 : vector<16x128xf32>
    %17 = vector.extract_strided_slice %8 {offsets = [0, 256], sizes = [16, 128], strides = [1, 1]} : vector<16x512xf32> to vector<16x128xf32>
    %18 = vector.extract_strided_slice %1 {offsets = [0, 2], sizes = [16, 1], strides = [1, 1]} : vector<16x4xf32> to vector<16x1xf32>
    %19 = vector.broadcast %18 : vector<16x1xf32> to vector<16x128xf32>
    %20 = arith.mulf %17, %19 : vector<16x128xf32>
    %21 = vector.extract_strided_slice %8 {offsets = [0, 384], sizes = [16, 128], strides = [1, 1]} : vector<16x512xf32> to vector<16x128xf32>
    %22 = vector.extract_strided_slice %1 {offsets = [0, 3], sizes = [16, 1], strides = [1, 1]} : vector<16x4xf32> to vector<16x1xf32>
    %23 = vector.broadcast %22 : vector<16x1xf32> to vector<16x128xf32>
    %24 = arith.mulf %21, %23 : vector<16x128xf32>
    %25 = tpu.concatenate %12, %16, %20, %24 in 1 : vector<16x128xf32>, vector<16x128xf32>, vector<16x128xf32>, vector<16x128xf32> -> vector<16x512xf32>
    %26 = arith.truncf %25 : vector<16x512xf32> to vector<16x512xbf16>
    %c0_8 = arith.constant 0 : index
    %c0_9 = arith.constant 0 : index
    %27 = vector.load %arg5[%c0_8, %c0_9] : memref<512x128xbf16, #tpu.memory_space<vmem>>, vector<512x128xbf16>
    %cst_10 = arith.constant dense<0.000000e+00> : vector<16x128xf32>
    %28 = tpu.matmul %26, %27, %cst_10 {dimension_numbers = #tpu.dot_dimension_numbers<[1], [0], [0], [1], [0, 0, 1, 1], [], []>} : vector<16x512xbf16>, vector<512x128xbf16>, vector<16x128xf32> -> vector<16x128xf32>
    %c0_11 = arith.constant 0 : index
    %c0_12 = arith.constant 0 : index
    %29 = vector.load %arg6[%c0_11, %c0_12] : memref<4x128xf32, #tpu.memory_space<vmem>>, vector<4x128xf32>
    %cst_13 = arith.constant dense<0.000000e+00> : vector<16x128xf32>
    %30 = tpu.matmul %1, %29, %cst_13 {dimension_numbers = #tpu.dot_dimension_numbers<[1], [0], [0], [1], [0, 0, 1, 1], [], []>} : vector<16x4xf32>, vector<4x128xf32>, vector<16x128xf32> -> vector<16x128xf32>
    %31 = arith.addf %28, %30 : vector<16x128xf32>
    %c0_14 = arith.constant 0 : index
    %c0_15 = arith.constant 0 : index
    %32 = vector.load %arg7[%c0_14, %c0_15] : memref<16x128xf32, #tpu.memory_space<vmem>>, vector<16x128xf32>
    tpu.vector_store %arg7[%c0_14, %c0_15], %31 {strides = array<i32>} : memref<16x128xf32, #tpu.memory_space<vmem>>, vector<16x128xf32>,
    return
  }
  func.func @transform_0(%arg0: i32) -> (i32, i32) {
    %c0_i32 = arith.constant 0 : i32
    %c0_i32_0 = arith.constant 0 : i32
    return %arg0, %c0_i32 : i32, i32
  }
  func.func @transform_1(%arg0: i32) -> (i32, i32) {
    %c0_i32 = arith.constant 0 : i32
    %c0_i32_0 = arith.constant 0 : i32
    return %arg0, %c0_i32 : i32, i32
  }
  func.func @transform_2(%arg0: i32) -> (i32, i32) {
    %c0_i32 = arith.constant 0 : i32
    %c0_i32_0 = arith.constant 0 : i32
    %c0_i32_1 = arith.constant 0 : i32
    return %c0_i32, %c0_i32_0 : i32, i32
  }
  func.func @transform_3(%arg0: i32) -> (i32, i32) {
    %c0_i32 = arith.constant 0 : i32
    %c0_i32_0 = arith.constant 0 : i32
    %c0_i32_1 = arith.constant 0 : i32
    return %c0_i32, %c0_i32_0 : i32, i32
  }
  func.func @transform_4(%arg0: i32) -> (i32, i32) {
    %c0_i32 = arith.constant 0 : i32
    %c0_i32_0 = arith.constant 0 : i32
    %c0_i32_1 = arith.constant 0 : i32
    return %c0_i32, %c0_i32_0 : i32, i32
  }
  func.func @transform_5(%arg0: i32) -> (i32, i32) {
    %c0_i32 = arith.constant 0 : i32
    %c0_i32_0 = arith.constant 0 : i32
    %c0_i32_1 = arith.constant 0 : i32
    return %c0_i32, %c0_i32_0 : i32, i32
  }
  func.func @transform_6(%arg0: i32) -> (i32, i32) {
    %c0_i32 = arith.constant 0 : i32
    %c0_i32_0 = arith.constant 0 : i32
    return %arg0, %c0_i32 : i32, i32
  }
}

module attributes {stable_mosaic.version = 11 : i64} {
  func.func @moe_fused_kernel(%arg0: i32, %arg1: memref<16x4xf32, #tpu.memory_space<vmem>>, %arg2: memref<16x128xbf16, #tpu.memory_space<vmem>>, %arg3: memref<128x512xbf16, #tpu.memory_space<vmem>>, %arg4: memref<1x512xf32, #tpu.memory_space<vmem>>, %arg5: memref<512x128xbf16, #tpu.memory_space<vmem>>, %arg6: memref<4x128xf32, #tpu.memory_space<vmem>>, %arg7: memref<16x128xf32, #tpu.memory_space<vmem>>) attributes {dimension_semantics = [#tpu.dimension_semantics<parallel>], iteration_bounds = array<i64: 1>, scalar_prefetch = 0 : i64, scratch_operands = 0 : i64, tpu.core_type = #tpu.core_type<tc>, window_params = [{transform_indices = @transform_0, window_bounds = array<i64: 16, 4>}, {transform_indices = @transform_1, window_bounds = array<i64: 16, 128>}, {pipeline_mode = #tpu.pipeline_mode<synchronous>, transform_indices = @transform_2, window_bounds = array<i64: 128, 512>}, {pipeline_mode = #tpu.pipeline_mode<synchronous>, transform_indices = @transform_3, window_bounds = array<i64: 1, 512>}, {pipeline_mode = #tpu.pipeline_mode<synchronous>, transform_indices = @transform_4, window_bounds = array<i64: 512, 128>}, {pipeline_mode = #tpu.pipeline_mode<synchronous>, transform_indices = @transform_5, window_bounds = array<i64: 4, 128>}, {transform_indices = @transform_6, window_bounds = array<i64: 16, 128>}]} {
    %c0 = arith.constant 0 : index
    %c0_0 = arith.constant 0 : index
    %0 = vector.load %arg2[%c0, %c0_0] : memref<16x128xbf16, #tpu.memory_space<vmem>>, vector<16x128xbf16>
    %c0_1 = arith.constant 0 : index
    %c0_2 = arith.constant 0 : index
    %1 = vector.load %arg1[%c0_1, %c0_2] : memref<16x4xf32, #tpu.memory_space<vmem>>, vector<16x4xf32>
    %c0_3 = arith.constant 0 : index
    %c0_4 = arith.constant 0 : index
    %2 = vector.load %arg3[%c0_3, %c0_4] : memref<128x512xbf16, #tpu.memory_space<vmem>>, vector<128x512xbf16>
    %cst = arith.constant dense<0.000000e+00> : vector<16x512xf32>
    %3 = tpu.matmul %0, %2, %cst {dimension_numbers = #tpu.dot_dimension_numbers<[1], [0], [0], [1], [0, 0, 1, 1], [], []>} : vector<16x128xbf16>, vector<128x512xbf16>, vector<16x512xf32> -> vector<16x512xf32>
    %c0_5 = arith.constant 0 : index
    %c0_6 = arith.constant 0 : index
    %4 = vector.load %arg4[%c0_5, %c0_6] : memref<1x512xf32, #tpu.memory_space<vmem>>, vector<1x512xf32>
    %5 = vector.broadcast %4 : vector<1x512xf32> to vector<16x512xf32>
    %6 = arith.addf %3, %5 : vector<16x512xf32>
    %cst_7 = arith.constant 0.000000e+00 : f32
    %7 = vector.broadcast %cst_7 : f32 to vector<16x512xf32>
    %8 = arith.maximumf %6, %7 : vector<16x512xf32>
    %9 = vector.extract_strided_slice %8 {offsets = [0, 0], sizes = [16, 128], strides = [1, 1]} : vector<16x512xf32> to vector<16x128xf32>
    %10 = vector.extract_strided_slice %1 {offsets = [0, 0], sizes = [16, 1], strides = [1, 1]} : vector<16x4xf32> to vector<16x1xf32>
    %11 = vector.broadcast %10 : vector<16x1xf32> to vector<16x128xf32>
    %12 = arith.mulf %9, %11 : vector<16x128xf32>
    %13 = vector.extract_strided_slice %8 {offsets = [0, 128], sizes = [16, 128], strides = [1, 1]} : vector<16x512xf32> to vector<16x128xf32>
    %14 = vector.extract_strided_slice %1 {offsets = [0, 1], sizes = [16, 1], strides = [1, 1]} : vector<16x4xf32> to vector<16x1xf32>
    %15 = vector.broadcast %14 : vector<16x1xf32> to vector<16x128xf32>
    %16 = arith.mulf %13, %15 : vector<16x128xf32>
    %17 = vector.extract_strided_slice %8 {offsets = [0, 256], sizes = [16, 128], strides = [1, 1]} : vector<16x512xf32> to vector<16x128xf32>
    %18 = vector.extract_strided_slice %1 {offsets = [0, 2], sizes = [16, 1], strides = [1, 1]} : vector<16x4xf32> to vector<16x1xf32>
    %19 = vector.broadcast %18 : vector<16x1xf32> to vector<16x128xf32>
    %20 = arith.mulf %17, %19 : vector<16x128xf32>
    %21 = vector.extract_strided_slice %8 {offsets = [0, 384], sizes = [16, 128], strides = [1, 1]} : vector<16x512xf32> to vector<16x128xf32>
    %22 = vector.extract_strided_slice %1 {offsets = [0, 3], sizes = [16, 1], strides = [1, 1]} : vector<16x4xf32> to vector<16x1xf32>
    %23 = vector.broadcast %22 : vector<16x1xf32> to vector<16x128xf32>
    %24 = arith.mulf %21, %23 : vector<16x128xf32>
    %25 = tpu.concatenate %12, %16, %20, %24 in 1 : vector<16x128xf32>, vector<16x128xf32>, vector<16x128xf32>, vector<16x128xf32> -> vector<16x512xf32>
    %26 = arith.truncf %25 : vector<16x512xf32> to vector<16x512xbf16>
    %c0_8 = arith.constant 0 : index
    %c0_9 = arith.constant 0 : index
    %27 = vector.load %arg5[%c0_8, %c0_9] : memref<512x128xbf16, #tpu.memory_space<vmem>>, vector<512x128xbf16>
    %cst_10 = arith.constant dense<0.000000e+00> : vector<16x128xf32>
    %28 = tpu.matmul %26, %27, %cst_10 {dimension_numbers = #tpu.dot_dimension_numbers<[1], [0], [0], [1], [0, 0, 1, 1], [], []>} : vector<16x512xbf16>, vector<512x128xbf16>, vector<16x128xf32> -> vector<16x128xf32>
    %c0_11 = arith.constant 0 : index
    %c0_12 = arith.constant 0 : index
    %29 = vector.load %arg6[%c0_11, %c0_12] : memref<4x128xf32, #tpu.memory_space<vmem>>, vector<4x128xf32>
    %cst_13 = arith.constant dense<0.000000e+00> : vector<16x128xf32>
    %30 = tpu.matmul %1, %29, %cst_13 {dimension_numbers = #tpu.dot_dimension_numbers<[1], [0], [0], [1], [0, 0, 1, 1], [], []>} : vector<16x4xf32>, vector<4x128xf32>, vector<16x128xf32> -> vector<16x128xf32>
    %31 = arith.addf %28, %30 : vector<16x128xf32>
    %c0_14 = arith.constant 0 : index
    %c0_15 = arith.constant 0 : index
    %32 = vector.load %arg7[%c0_14, %c0_15] : memref<16x128xf32, #tpu.memory_space<vmem>>, vector<16x128xf32>
    tpu.vector_store %arg7[%c0_14, %c0_15], %31 {strides = array<i32>} : memref<16x128xf32, #tpu.memory_space<vmem>>, vector<16x128xf32>,
    return
  }
  func.func @transform_0(%arg0: i32) -> (i32, i32) {
    %c0_i32 = arith.constant 0 : i32
    %c0_i32_0 = arith.constant 0 : i32
    return %arg0, %c0_i32 : i32, i32
  }
  func.func @transform_1(%arg0: i32) -> (i32, i32) {
    %c0_i32 = arith.constant 0 : i32
    %c0_i32_0 = arith.constant 0 : i32
    return %arg0, %c0_i32 : i32, i32
  }
  func.func @transform_2(%arg0: i32) -> (i32, i32) {
    %c0_i32 = arith.constant 0 : i32
    %c0_i32_0 = arith.constant 0 : i32
    %c0_i32_1 = arith.constant 0 : i32
    return %c0_i32, %c0_i32_0 : i32, i32
  }
  func.func @transform_3(%arg0: i32) -> (i32, i32) {
    %c0_i32 = arith.constant 0 : i32
    %c0_i32_0 = arith.constant 0 : i32
    %c0_i32_1 = arith.constant 0 : i32
    return %c0_i32, %c0_i32_0 : i32, i32
  }
  func.func @transform_4(%arg0: i32) -> (i32, i32) {
    %c0_i32 = arith.constant 0 : i32
    %c0_i32_0 = arith.constant 0 : i32
    %c0_i32_1 = arith.constant 0 : i32
    return %c0_i32, %c0_i32_0 : i32, i32
  }
  func.func @transform_5(%arg0: i32) -> (i32, i32) {
    %c0_i32 = arith.constant 0 : i32
    %c0_i32_0 = arith.constant 0 : i32
    %c0_i32_1 = arith.constant 0 : i32
    return %c0_i32, %c0_i32_0 : i32, i32
  }
  func.func @transform_6(%arg0: i32) -> (i32, i32) {
    %c0_i32 = arith.constant 0 : i32
    %c0_i32_0 = arith.constant 0 : i32
    return %arg0, %c0_i32 : i32, i32
  }
}

</mosaic_0001>

<bundles_post_ra>
// kernel: tpu_custom_call.1
= control target key start
LH: loop header
LB: loop body
LE: loop exit
PB: predicated region body
PF: predicated region fallthrough
CT: control target
= control target key end

     0   :  { %11 = vsyncpa [#allocation3], 0  ;;  %s1256_s0 = inlined_call_operand.vmem [shape: f32[16,4], index: 0, kind: input, shape index: {}]   ;;  %s1257_s1 = inlined_call_operand.vmem [shape: bf16[16,128], index: 1, kind: input, shape index: {}]   ;;  %s1258_s2 = inlined_call_operand.hbm [shape: bf16[128,512], index: 2, kind: input, shape index: {}]   ;;  %s1259_s3 = inlined_call_operand.vmem [shape: f32[1,512], index: 3, kind: input, shape index: {}]   ;;  %s1260_s4 = inlined_call_operand.hbm [shape: bf16[512,128], index: 4, kind: input, shape index: {}]   ;;  %s1261_s5 = inlined_call_operand.vmem [shape: f32[4,128], index: 5, kind: input, shape index: {}]   ;;  %s1262_s6 = inlined_call_operand.hbm [shape: f32[16,128], index: 6, kind: output, shape index: {}]  }
   0x1   :  { %12 = vsyncpa [#allocation6], 0 }
   0x2   :  { %13 = vsyncpa [#allocation4], 0  ;;  %s1153_s21 = smov [#allocation2]   ;;  %s1081_s25 = scalar_lea.hbm %s1258_s2, 4096 }
   0x3   :  { %s23_s22 = sshll.u32 %s1153_s21, 4  ;;  %p1082_p0 = scmp.ne.s32.totalorder %s1258_s2, %s1081_s25  ;;  %s24_s22 = int_to_ptr.vmem [resolvable:$true] %s23_s22 }
   0x4   :  { %p1085_p1 = scmp.lt.u32.totalorder %s1081_s25, %s1258_s2 }
   0x6   :  { %p1087_p2 = pnand %p1085_p1, %p1082_p0 }
   0x8   :  { %1090 = shalt.err (!%p1087_p2)
}
   0x9   :  { %s1091_s30 = scalar_lea.vmem %s24_s22, 4096  ;;  %p1096_p4 = scmp.lt.s32.totalorder %s24_s22, %s24_s22 }
   0xa   :  { %p1092_p3 = scmp.ne.s32.totalorder %s24_s22, %s1091_s30  ;;  %p1097_p5 = scmp.lt.s32.totalorder %s1091_s30, %s1091_s30 }
   0xc   :  { %p1098_p6 = por %p1097_p5, %p1096_p4 }
   0xe   :  { %p1099_p7 = pnand %p1098_p6, %p1092_p3 }
  0x10   :  { %1102 = shalt.err (!%p1099_p7)
}
  0x11   :  { %s1154_s7 = smov 256   ;;  %s1155_s8 = smov 16  }
  0x12   :  { %29 = dma.hbm_to_vmem [thread:$0]  %s1258_s2, 4096, %s24_s22, [#allocation3], %s1154_s7, %s1154_s7, %s1155_s8  }
  0x13   :  { %s1156_s11 = smov [#allocation5]   ;;  %s1103_s15 = scalar_lea.hbm %s1260_s4, 4096 }
  0x14   :  { %s37_s12 = sshll.u32 %s1156_s11, 4  ;;  %p1104_p8 = scmp.ne.s32.totalorder %s1260_s4, %s1103_s15  ;;  %s38_s12 = int_to_ptr.vmem [resolvable:$true] %s37_s12 }
  0x15   :  { %p1107_p9 = scmp.lt.u32.totalorder %s1103_s15, %s1260_s4 }
  0x17   :  { %p1109_p10 = pnand %p1107_p9, %p1104_p8 }
  0x19   :  { %1112 = shalt.err (!%p1109_p10)
}
  0x1a   :  { %s1113_s20 = scalar_lea.vmem %s38_s12, 4096  ;;  %p1118_p12 = scmp.lt.s32.totalorder %s38_s12, %s38_s12 }
  0x1b   :  { %p1114_p11 = scmp.ne.s32.totalorder %s38_s12, %s1113_s20  ;;  %p1119_p13 = scmp.lt.s32.totalorder %s1113_s20, %s1113_s20 }
  0x1d   :  { %p1120_p0 = por %p1119_p13, %p1118_p12 }
  0x1f   :  { %p1121_p1 = pnand %p1120_p0, %p1114_p11 }
  0x21   :  { %1124 = shalt.err (!%p1121_p1)
}
  0x22   :  { %s1157_s2 = smov 64   ;;  %s1158_s21 = smov 4  }
  0x23   :  { %43 = dma.hbm_to_vmem [thread:$0]  %s1260_s4, 4096, %s38_s12, [#allocation6], %s1157_s2, %s1157_s2, %s1158_s21  }
  0x24   :  { %1147 = dma.done.wait [#allocation3], 4096  }
  0x25   :  { %1148 = vsyncadd [#allocation3], 4294963200 }
  0x26   :  { %1149 = dma.done.wait [#allocation6], 4096  }
  0x27   :  { %1150 = vsyncadd [#allocation6], 4294963200  ;;  %v1159_v0 = vmov 0   ;;  %v1160_v1 = vmov 1   ;;  %v1000_v2 = vld [vmem:[#allocation2 + $0x4] ss:$16 sps:$4 sm:$0xff]  }
  0x28   :  { %309 = vmatprep.mubr.bf16.mxu0 %v1159_v0  ;;  %352 = vmatprep.mubr.bf16.mxu1 %v1159_v0  ;;  %v1002_v3 = vld [vmem:[#allocation2 + $0xc] ss:$16 sps:$4 sm:$0xff]   ;;  %v1004_v4 = vld [vmem:[#allocation2] ss:$16 sps:$4 sm:$0xff]   ;;  %v1005_v5 = vld [vmem:[#allocation2 + $0x8] ss:$16 sps:$4 sm:$0xff]  }
  0x29   :  { %993 = vset.pattern.permute.xlu0 %v1160_v1  ;;  %994 = vset.pattern.permute.xlu1 %v1159_v0  ;;  %v1006_v6 = vld [vmem:[#allocation2 + $0x24] ss:$16 sps:$4 sm:$0xff]   ;;  %v1008_v7 = vld [vmem:[#allocation2 + $0x2c] ss:$16 sps:$4 sm:$0xff]   ;;  %v1010_v8 = vld [vmem:[#allocation2 + $0x20] ss:$16 sps:$4 sm:$0xff]  }
  0x2a   :  { %277 = vmatprep.subr.bf16.mxu0 %v1000_v2  ;;  %320 = vmatprep.subr.bf16.mxu1 %v1002_v3  ;;  %v1011_v9 = vld [vmem:[#allocation2 + $0x28] ss:$16 sps:$4 sm:$0xff]   ;;  %v1012_v10 = vld [vmem:[#allocation2 + $0x44] ss:$16 sps:$4 sm:$0xff]   ;;  %v1014_v11 = vld [vmem:[#allocation2 + $0x4c] ss:$16 sps:$4 sm:$0xff]  }
  0x2b   :  { %278 = vmatpush1.bf16.msra.mxu0 %v1004_v4  ;;  %321 = vmatpush1.bf16.msra.mxu1 %v1005_v5  ;;  %v1016_v12 = vld [vmem:[#allocation2 + $0x40] ss:$16 sps:$4 sm:$0xff]   ;;  %v1017_v13 = vld [vmem:[#allocation2 + $0x48] ss:$16 sps:$4 sm:$0xff]   ;;  %v1018_v14 = vld [vmem:[#allocation2 + $0x64] ss:$16 sps:$4 sm:$0xff]  }
  0x2c   :  { %279 = vmatprep.subr.bf16.mxu0 %v1006_v6  ;;  %322 = vmatprep.subr.bf16.mxu1 %v1008_v7  ;;  %v1020_v15 = vld [vmem:[#allocation2 + $0x6c] ss:$16 sps:$4 sm:$0xff]   ;;  %v1022_v16 = vld [vmem:[#allocation2 + $0x60] ss:$16 sps:$4 sm:$0xff]   ;;  %v1023_v17 = vld [vmem:[#allocation2 + $0x68] ss:$16 sps:$4 sm:$0xff]  }
  0x2d   :  { %v1024_v18 = vld [vmem:[#allocation2 + $0x84] ss:$16 sps:$4 sm:$0xff]   ;;  %v1026_v19 = vld [vmem:[#allocation2 + $0x8c] ss:$16 sps:$4 sm:$0xff]   ;;  %v1028_v20 = vld [vmem:[#allocation2 + $0x80] ss:$16 sps:$4 sm:$0xff]  }
  0x2e   :  { %v1029_v21 = vld [vmem:[#allocation2 + $0x88] ss:$16 sps:$4 sm:$0xff]   ;;  %v1030_v22 = vld [vmem:[#allocation2 + $0xa4] ss:$16 sps:$4 sm:$0xff]   ;;  %v1032_v23 = vld [vmem:[#allocation2 + $0xac] ss:$16 sps:$4 sm:$0xff]  }
  0x2f   :  { %280 = vmatpush1.bf16.msra.mxu0 %v1010_v8  ;;  %323 = vmatpush1.bf16.msra.mxu1 %v1011_v9  ;;  %v1034_v24 = vld [vmem:[#allocation2 + $0xa0] ss:$16 sps:$4 sm:$0xff]   ;;  %v1035_v25 = vld [vmem:[#allocation2 + $0xa8] ss:$16 sps:$4 sm:$0xff]   ;;  %v1036_v26 = vld [vmem:[#allocation2 + $0xc4] ss:$16 sps:$4 sm:$0xff]   ;;  %v91_v9 = vlaneseq }
  0x30   :  { %281 = vmatprep.subr.bf16.mxu0 %v1012_v10  ;;  %324 = vmatprep.subr.bf16.mxu1 %v1014_v11  ;;  %v1038_v27 = vld [vmem:[#allocation2 + $0xcc] ss:$16 sps:$4 sm:$0xff]   ;;  %v1040_v28 = vld [vmem:[#allocation2 + $0xc0] ss:$16 sps:$4 sm:$0xff]   ;;  %v1041_v29 = vld [vmem:[#allocation2 + $0xc8] ss:$16 sps:$4 sm:$0xff]  }
  0x31   :  { %v55_v30 = vld [vmem:[%s1256_s0] sm:$0xff]  ;;  %v56_v32 = vld [vmem:[%s1256_s0 + $0x8] sm:$0xff]  ;;  %vm487_vm0 = vcmask 1043456   ;;  %v1161_v38 = vmov 3   ;;  %vm482_vm1 = vcmask 31744   ;;  %v1162_v43 = vmov 2  }
  0x32   :  { %v1042_v31 = vld [vmem:[#allocation2 + $0xe4] ss:$16 sps:$4 sm:$0xff]   ;;  %373 = vperm.xlu1 %994, %v55_v30   ;;  %384 = vperm.xlu0 %993, %v55_v30   ;;  %v1044_v33 = vld [vmem:[#allocation2 + $0xec] ss:$16 sps:$4 sm:$0xff]   ;;  %v1046_v34 = vld [vmem:[#allocation2 + $0xe0] ss:$16 sps:$4 sm:$0xff]  }
  0x33   :  { %282 = vmatpush1.bf16.msra.mxu0 %v1016_v12  ;;  %325 = vmatpush1.bf16.msra.mxu1 %v1017_v13  ;;  %v1047_v35 = vld [vmem:[#allocation2 + $0xe8] ss:$16 sps:$4 sm:$0xff]   ;;  %v1048_v36 = vld [vmem:[%s1257_s1] sm:$0xff]   ;;  %v1057_v46 = vld [vmem:[#allocation5 + $0x50] sm:$0xff]   ;;  %v92_v12 = vshrl.u32 %v91_v9, 7 }
  0x34   :  { %283 = vmatprep.subr.bf16.mxu0 %v1018_v14  ;;  %326 = vmatprep.subr.bf16.mxu1 %v1020_v15  ;;  %v1049_v37 = vld [vmem:[#allocation5 + $0x40] sm:$0xff]   ;;  %v1053_v42 = vld [vmem:[#allocation5 + $0x48] sm:$0xff]   ;;  %v1058_v49 = vld [vmem:[#allocation5 + $0xd0] sm:$0xff]  }
  0x35   :  { %v481_v39 = vld [vmem:[%s1261_s5] sm:$0xf]  ;;  %v1055_v45 = vld [vmem:[#allocation5 + $0x8] sm:$0xff]   ;;  %v1059_v50 = vld [vmem:[#allocation5 + $0x10] sm:$0xff]   ;;  %v93_v13 = vsub.s32 0, %v92_v12  ;;  %v101_v14 = vsub.s32 2, %v92_v12 }
  0x36   :  { %378 = vperm.xlu1 %994, %v56_v32   ;;  %388 = vperm.xlu0 %993, %v56_v32   ;;  %v1050_v40 = vld [vmem:[#allocation5 + $0xc0] sm:$0xff]   ;;  %v1054_v47 = vld [vmem:[#allocation5 + $0xc8] sm:$0xff]   ;;  %v1061_v51 = vld [vmem:[#allocation5 + $0x58] sm:$0xff]  }
  0x37   :  { %284 = vmatpush1.bf16.msra.mxu0 %v1022_v16  ;;  %327 = vmatpush1.bf16.msra.mxu1 %v1023_v17  ;;  %v1051_v41 = vld [vmem:[#allocation5] sm:$0xff]   ;;  %v1056_v48 = vld [vmem:[#allocation5 + $0x88] sm:$0xff]   ;;  %v1063_v52 = vld [vmem:[#allocation5 + $0x18] sm:$0xff]  }
  0x38   :  { %285 = vmatprep.subr.bf16.mxu0 %v1024_v18  ;;  %328 = vmatprep.subr.bf16.mxu1 %v1026_v19  ;;  %v1052_v44 = vld [vmem:[#allocation5 + $0x80] sm:$0xff]   ;;  %v1060_v53 = vld [vmem:[#allocation5 + $0x90] sm:$0xff]   ;;  %v1062_v55 = vld [vmem:[#allocation5 + $0xd8] sm:$0xff]   ;;  %v97_v18 = vsub.s32 1, %v92_v12  ;;  %v105_v19 = vsub.s32 3, %v92_v12 }
  0x39   :  { %v1065_v54 = vld [vmem:[#allocation5 + $0x60] sm:$0xff]   ;;  %v1064_v57 = vld [vmem:[#allocation5 + $0x98] sm:$0xff]   ;;  %v1069_v60 = vld [vmem:[#allocation5 + $0x68] sm:$0xff]  }
  0x3a   :  { %996 = vset.pattern.permute.xlu1 %v1161_v38  ;;  %995 = vset.pattern.permute.xlu0 %v1161_v38  ;;  %v1067_v56 = vld [vmem:[#allocation5 + $0x20] sm:$0xff]   ;;  %v1070_v61 = vld [vmem:[#allocation5 + $0xe8] sm:$0xff]   ;;  %v1073_v0 = vld [vmem:[#allocation5 + $0x70] sm:$0xff]  }
  0x3b   :  { %286 = vmatpush1.bf16.msra.mxu0 %v1028_v20  ;;  %329 = vmatpush1.bf16.msra.mxu1 %v1029_v21  ;;  %v1066_v58 = vld [vmem:[#allocation5 + $0xe0] sm:$0xff]   ;;  %v1071_v62 = vld [vmem:[#allocation5 + $0x28] sm:$0xff]   ;;  %v1074_v1 = vld [vmem:[#allocation5 + $0xf0] sm:$0xff]  }
  0x3c   :  { %287 = vmatprep.subr.bf16.mxu0 %v1030_v22  ;;  %330 = vmatprep.subr.bf16.mxu1 %v1032_v23  ;;  %v1068_v59 = vld [vmem:[#allocation5 + $0xa0] sm:$0xff]   ;;  %v1072_v63 = vld [vmem:[#allocation5 + $0xa8] sm:$0xff]   ;;  %v1075_v2 = vld [vmem:[#allocation5 + $0x30] sm:$0xff]  }
  0x3d   :  { %408 = vperm.xlu1 %996, %v56_v32   ;;  %404 = vperm.xlu0 %995, %v55_v30   ;;  %v1076_v3 = vld [vmem:[#allocation5 + $0xb0] sm:$0xff]   ;;  %v1077_v4 = vld [vmem:[#allocation5 + $0x78] sm:$0xff]   ;;  %v89_v17 = vld [vmem:[%s1259_s3] sm:$0xf]  ;;  %s1163_s3 = smov [#allocation7]  }
  0x3e   :  { %v1078_v5 = vld [vmem:[#allocation5 + $0xf8] sm:$0xff]   ;;  %v94_v20 = vrot.slane %v89_v17, %v93_v13  ;;  %v102_v21 = vrot.slane %v89_v17, %v101_v14  ;;  %v98_v22 = vrot.slane %v89_v17, %v97_v18  ;;  %v106_v23 = vrot.slane %v89_v17, %v105_v19  ;;  %s847_s30 = sshll.u32 %s1163_s3, 4  ;;  %s848_s30 = int_to_ptr.vmem [resolvable:$true] %s847_s30 }
  0x3f   :  { %288 = vmatpush1.bf16.msra.mxu0 %v1034_v24  ;;  %331 = vmatpush1.bf16.msra.mxu1 %v1035_v25  ;;  %v1079_v6 = vld [vmem:[#allocation5 + $0x38] sm:$0xff]   ;;  %s1125_s7 = scalar_lea.vmem %s848_s30, 256  ;;  %p1130_p3 = scmp.lt.s32.totalorder %s848_s30, %s848_s30 }
  0x40   :  { %289 = vmatprep.subr.bf16.mxu0 %v1036_v26  ;;  %332 = vmatprep.subr.bf16.mxu1 %v1038_v27  ;;  %v1080_v7 = vld [vmem:[#allocation5 + $0xb8] sm:$0xff]   ;;  %p1126_p2 = scmp.ne.s32.totalorder %s848_s30, %s1125_s7  ;;  %p1131_p4 = scmp.lt.s32.totalorder %s1125_s7, %s1125_s7 }
  0x41   :  { %997 = vset.pattern.permute.xlu1 %v1162_v43  ;;  %998 = vset.pattern.permute.xlu0 %v1162_v43 }
  0x42   :  { %394 = vperm.xlu1 %997, %v55_v30   ;;  %398 = vperm.xlu0 %998, %v56_v32   ;;  %p1132_p5 = por %p1131_p4, %p1130_p3 }
  0x43   :  { %290 = vmatpush1.bf16.msra.mxu0 %v1040_v28  ;;  %333 = vmatpush1.bf16.msra.mxu1 %v1041_v29 }
  0x44   :  { %291 = vmatprep.subr.bf16.mxu0 %v1042_v31  ;;  %334 = vmatprep.subr.bf16.mxu1 %v1044_v33  ;;  %p1133_p6 = pnand %p1132_p5, %p1126_p2 }
  0x46   :  { %999 = vset.pattern.permute.xlu0 %v1161_v38 }
  0x47   :  { %292 = vmatpush1.bf16.msra.mxu0 %v1046_v34  ;;  %335 = vmatpush1.bf16.msra.mxu1 %v1047_v35 }
  0x48   :  { %975 = vmatprep.subr.msk.mxu0 %vm487_vm0, %v481_v39  ;;  %931 = vmatprep.subr.bf16.mxu1 %v1049_v37 }
  0x4a   :  { %310 = vmatmul.mubr.bf16.vlgmr.msra.gmra.mrb[0].mxu0 %v1048_v36  ;;  %353 = vmatmul.mubr.bf16.vlgmr.msra.gmra.mrb[0].mxu1 %v1048_v36 }
  0x4b   :  { %976 = vmatpush3.msk.msra.mxu0 %vm487_vm0, %v481_v39  ;;  %977 = vmatprep.mubr.msk.f32.mxu0 %vm482_vm1, %v55_v30 }
  0x4c   :  { %953 = vmatprep.subr.bf16.mxu0 %v1050_v40  ;;  %932 = vmatpush3.bf16.msra.mxu1 %v1051_v41 }
  0x4d   :  { %933 = vmatprep.subr.bf16.mxu1 %v1053_v42 }
  0x50   :  { %934 = vmatpush3.bf16.msra.mxu1 %v1055_v45 }
  0x51   :  { %935 = vmatprep.subr.bf16.mxu1 %v1057_v46 }
  0x52   :  { %978 = vmatmul.mubr.msk.f32.vlgmr.msra.gmra.mrb[4].mxu0 %vm482_vm1, %v56_v32 }
  0x53   :  { %954 = vmatpush3.bf16.msra.mxu0 %v1052_v44 }
  0x54   :  { %955 = vmatprep.subr.bf16.mxu0 %v1054_v47  ;;  %936 = vmatpush3.bf16.msra.mxu1 %v1059_v50 }
  0x55   :  { %937 = vmatprep.subr.bf16.mxu1 %v1061_v51 }
  0x57   :  { %956 = vmatpush3.bf16.msra.mxu0 %v1056_v48 }
  0x58   :  { %957 = vmatprep.subr.bf16.mxu0 %v1058_v49  ;;  %938 = vmatpush3.bf16.msra.mxu1 %v1063_v52 }
  0x59   :  { %939 = vmatprep.subr.bf16.mxu1 %v1065_v54 }
  0x5b   :  { %958 = vmatpush3.bf16.msra.mxu0 %v1060_v53 }
  0x5c   :  { %959 = vmatprep.subr.bf16.mxu0 %v1062_v55  ;;  %940 = vmatpush3.bf16.msra.mxu1 %v1067_v56 }
  0x5d   :  { %941 = vmatprep.subr.bf16.mxu1 %v1069_v60 }
  0x5f   :  { %960 = vmatpush3.bf16.msra.mxu0 %v1064_v57 }
  0x60   :  { %961 = vmatprep.subr.bf16.mxu0 %v1066_v58  ;;  %942 = vmatpush3.bf16.msra.mxu1 %v1071_v62 }
  0x61   :  { %943 = vmatprep.subr.bf16.mxu1 %v1073_v0 }
  0x63   :  { %962 = vmatpush3.bf16.msra.mxu0 %v1068_v59 }
  0x64   :  { %963 = vmatprep.subr.bf16.mxu0 %v1070_v61  ;;  %944 = vmatpush3.bf16.msra.mxu1 %v1075_v2 }
  0x65   :  { %945 = vmatprep.subr.bf16.mxu1 %v1077_v4 }
  0x67   :  { %964 = vmatpush3.bf16.msra.mxu0 %v1072_v63 }
  0x68   :  { %965 = vmatprep.subr.bf16.mxu0 %v1074_v1  ;;  %946 = vmatpush3.bf16.msra.mxu1 %v1079_v6 }
  0x6b   :  { %966 = vmatpush3.bf16.msra.mxu0 %v1076_v3 }
  0x6c   :  { %967 = vmatprep.subr.bf16.mxu0 %v1078_v5 }
  0x6f   :  { %968 = vmatpush3.bf16.msra.mxu0 %v1080_v7 }
  0xb1   :  { %v374_v8 = vpop.permute.xlu1 %373  ;;  %v385_v10 = vpop.permute.xlu0 %384 }
  0xb5   :  { %v379_v11 = vpop.permute.xlu1 %378  ;;  %v389_v16 = vpop.permute.xlu0 %388 }
  0xbc   :  { %v409_v15 = vpop.permute.xlu1 %408  ;;  %v405_v24 = vpop.permute.xlu0 %404 }
  0xc1   :  { %v395_v25 = vpop.permute.xlu1 %394  ;;  %v399_v46 = vpop.permute.xlu0 %398 }
 0x11d   :  { %v311_v26 = vpop.f32.mrb[0].mxu0  ;;  %v354_v27 = vpop.f32.mrb[0].mxu1 }
 0x11e   :  { %v312_v28 = vadd.f32 %v311_v26, %v94_v20  ;;  %v355_v29 = vadd.f32 %v354_v27, %v102_v21  ;;  %v313_v30 = vpop.f32.mrb[1].mxu0  ;;  %v356_v31 = vpop.f32.mrb[1].mxu1 }
 0x11f   :  { %v314_v32 = vadd.f32 %v313_v30, %v98_v22  ;;  %v357_v33 = vadd.f32 %v356_v31, %v106_v23  ;;  %v315_v34 = vpop.f32.mrb[2].mxu0  ;;  %v358_v35 = vpop.f32.mrb[2].mxu1 }
 0x120   :  { %v363_v36 = vmax.f32 %v312_v28, 0.0  ;;  %v365_v37 = vmax.f32 %v355_v29, 0.0  ;;  %v316_v38 = vadd.f32 %v315_v34, %v94_v20  ;;  %v359_v39 = vadd.f32 %v358_v35, %v102_v21  ;;  %v317_v40 = vpop.f32.mrb[3].mxu0  ;;  %v360_v41 = vpop.f32.mrb[3].mxu1 }
 0x121   :  { %v364_v42 = vmax.f32 %v314_v32, 0.0  ;;  %v366_v43 = vmax.f32 %v357_v33, 0.0  ;;  %v318_v44 = vadd.f32 %v317_v40, %v98_v22  ;;  %v361_v45 = vadd.f32 %v360_v41, %v106_v23 }
 0x122   :  { %v367_v47 = vmax.f32 %v316_v38, 0.0  ;;  %v369_v48 = vmax.f32 %v359_v39, 0.0  ;;  %v401_v49 = vmul.f32 %v395_v25, %v365_v37  ;;  %v381_v52 = vmul.f32 %v374_v8, %v363_v36 }
 0x123   :  { %v368_v50 = vmax.f32 %v318_v44, 0.0  ;;  %v370_v51 = vmax.f32 %v361_v45, 0.0  ;;  %v391_v55 = vmul.f32 %v385_v10, %v364_v42  ;;  %v411_v56 = vmul.f32 %v405_v24, %v366_v43 }
 0x124   :  { %v382_v53 = vmul.f32 %v379_v11, %v367_v47  ;;  %v402_v54 = vmul.f32 %v399_v46, %v369_v48 }
 0x125   :  { %v392_v57 = vmul.f32 %v389_v16, %v368_v50  ;;  %v412_v58 = vmul.f32 %v409_v15, %v370_v51  ;;  %v979_v59 = vpop.f32.mrb[4].mxu0 }
 0x126   :  { %v413_v60 = vpack.c.bf16 %v382_v53, %v381_v52  ;;  %v415_v61 = vpack.c.bf16 %v402_v54, %v401_v49  ;;  %v557_v62 = vpop.f32.mrb[5].mxu0 }
 0x127   :  { %v414_v63 = vpack.c.bf16 %v392_v57, %v391_v55  ;;  %v416_v0 = vpack.c.bf16 %v412_v58, %v411_v56 }
 0x129   :  { %790 = vmatprep.mubr.bf16.mxu1 %v414_v63  ;;  %831 = vmatprep.mubr.bf16.mxu0 %v416_v0 }
 0x12a   :  { %791 = vmatmul.mubr.bf16.vlgmr.msra.gmra.mrb[4].mxu1 %v413_v60  ;;  %832 = vmatmul.mubr.bf16.vlgmr.msra.gmra.mrb[8].mxu0 %v415_v61 }
 0x1fd   :  { %v947_v1 = vpop.f32.mrb[4].mxu1  ;;  %v969_v2 = vpop.f32.mrb[8].mxu0 }
 0x1fe   :  { %v948_v3 = vpop.f32.mrb[5].mxu1  ;;  %v970_v4 = vpop.f32.mrb[9].mxu0 }
 0x1ff   :  { %v949_v5 = vadd.f32 %v948_v3, %v947_v1  ;;  %v971_v6 = vadd.f32 %v970_v4, %v969_v2  ;;  %v950_v7 = vpop.f32.mrb[6].mxu1  ;;  %v972_v8 = vpop.f32.mrb[10].mxu0 }
 0x200   :  { %v951_v9 = vpop.f32.mrb[7].mxu1  ;;  %v973_v10 = vpop.f32.mrb[11].mxu0 }
 0x201   :  { %v793_v11 = vadd.f32 %v949_v5, %v557_v62  ;;  %v952_v12 = vadd.f32 %v951_v9, %v950_v7  ;;  %v974_v13 = vadd.f32 %v973_v10, %v972_v8 }
 0x203   :  { %v834_v14 = vadd.f32 %v971_v6, %v793_v11  ;;  %v796_v15 = vadd.f32 %v979_v59, %v952_v12 }
 0x205   :  { %840 = vst [vmem:[#allocation7] sm:$0xff] %v834_v14  ;;  %v837_v16 = vadd.f32 %v974_v13, %v796_v15 }
 0x207   :  { %841 = vst [vmem:[#allocation7 + $0x8] sm:$0xff] %v837_v16 }
 0x208   :  { %1136 = shalt.err (!%p1133_p6)
}
 0x209   :  { %s1137_s10 = scalar_lea.hbm %s1262_s6, 256 }
 0x20a   :  { %p1138_p7 = scmp.ne.s32.totalorder %s1262_s6, %s1137_s10  ;;  %p1141_p8 = scmp.lt.u32.totalorder %s1137_s10, %s1262_s6 }
 0x20c   :  { %p1143_p9 = pnand %p1141_p8, %p1138_p7 }
 0x20e   :  { %1146 = shalt.err (!%p1143_p9)
}
 0x20f   :  { %s1164_s15 = smov 128   ;;  %s1165_s16 = smov 8  }
 0x210   :  { %853 = dma.vmem_to_hbm [thread:$0]  %s848_s30, 256, %s1262_s6, [#allocation4], %s1164_s15, %s1164_s15, %s1165_s16  }
 0x211   :  { %1151 = dma.done.wait [#allocation4], 256  }
 0x212   :  { %1152 = vsyncadd [#allocation4], 4294967040 }
 0x213   :  { %857 = vsyncpa [#allocation3], 1 }
 0x214   :  { %858 = vsyncpa [#allocation6], 1 }
 0x215   :  { %859 = vsyncpa [#allocation4], 1 }

// kernel: tpu_custom_call.1
= control target key start
LH: loop header
LB: loop body
LE: loop exit
PB: predicated region body
PF: predicated region fallthrough
CT: control target
= control target key end

     0   :  { %11 = vsyncpa [#allocation3], 0  ;;  %s1256_s0 = inlined_call_operand.vmem [shape: f32[16,4], index: 0, kind: input, shape index: {}]   ;;  %s1257_s1 = inlined_call_operand.vmem [shape: bf16[16,128], index: 1, kind: input, shape index: {}]   ;;  %s1258_s2 = inlined_call_operand.hbm [shape: bf16[128,512], index: 2, kind: input, shape index: {}]   ;;  %s1259_s3 = inlined_call_operand.vmem [shape: f32[1,512], index: 3, kind: input, shape index: {}]   ;;  %s1260_s4 = inlined_call_operand.hbm [shape: bf16[512,128], index: 4, kind: input, shape index: {}]   ;;  %s1261_s5 = inlined_call_operand.vmem [shape: f32[4,128], index: 5, kind: input, shape index: {}]   ;;  %s1262_s6 = inlined_call_operand.hbm [shape: f32[16,128], index: 6, kind: output, shape index: {}]  }
   0x1   :  { %12 = vsyncpa [#allocation6], 0 }
   0x2   :  { %13 = vsyncpa [#allocation4], 0  ;;  %s1153_s21 = smov [#allocation2]   ;;  %s1081_s25 = scalar_lea.hbm %s1258_s2, 4096 }
   0x3   :  { %s23_s22 = sshll.u32 %s1153_s21, 4  ;;  %p1082_p0 = scmp.ne.s32.totalorder %s1258_s2, %s1081_s25  ;;  %s24_s22 = int_to_ptr.vmem [resolvable:$true] %s23_s22 }
   0x4   :  { %p1085_p1 = scmp.lt.u32.totalorder %s1081_s25, %s1258_s2 }
   0x6   :  { %p1087_p2 = pnand %p1085_p1, %p1082_p0 }
   0x8   :  { %1090 = shalt.err (!%p1087_p2)
}
   0x9   :  { %s1091_s30 = scalar_lea.vmem %s24_s22, 4096  ;;  %p1096_p4 = scmp.lt.s32.totalorder %s24_s22, %s24_s22 }
   0xa   :  { %p1092_p3 = scmp.ne.s32.totalorder %s24_s22, %s1091_s30  ;;  %p1097_p5 = scmp.lt.s32.totalorder %s1091_s30, %s1091_s30 }
   0xc   :  { %p1098_p6 = por %p1097_p5, %p1096_p4 }
   0xe   :  { %p1099_p7 = pnand %p1098_p6, %p1092_p3 }
  0x10   :  { %1102 = shalt.err (!%p1099_p7)
}
  0x11   :  { %s1154_s7 = smov 256   ;;  %s1155_s8 = smov 16  }
  0x12   :  { %29 = dma.hbm_to_vmem [thread:$0]  %s1258_s2, 4096, %s24_s22, [#allocation3], %s1154_s7, %s1154_s7, %s1155_s8  }
  0x13   :  { %s1156_s11 = smov [#allocation5]   ;;  %s1103_s15 = scalar_lea.hbm %s1260_s4, 4096 }
  0x14   :  { %s37_s12 = sshll.u32 %s1156_s11, 4  ;;  %p1104_p8 = scmp.ne.s32.totalorder %s1260_s4, %s1103_s15  ;;  %s38_s12 = int_to_ptr.vmem [resolvable:$true] %s37_s12 }
  0x15   :  { %p1107_p9 = scmp.lt.u32.totalorder %s1103_s15, %s1260_s4 }
  0x17   :  { %p1109_p10 = pnand %p1107_p9, %p1104_p8 }
  0x19   :  { %1112 = shalt.err (!%p1109_p10)
}
  0x1a   :  { %s1113_s20 = scalar_lea.vmem %s38_s12, 4096  ;;  %p1118_p12 = scmp.lt.s32.totalorder %s38_s12, %s38_s12 }
  0x1b   :  { %p1114_p11 = scmp.ne.s32.totalorder %s38_s12, %s1113_s20  ;;  %p1119_p13 = scmp.lt.s32.totalorder %s1113_s20, %s1113_s20 }
  0x1d   :  { %p1120_p0 = por %p1119_p13, %p1118_p12 }
  0x1f   :  { %p1121_p1 = pnand %p1120_p0, %p1114_p11 }
  0x21   :  { %1124 = shalt.err (!%p1121_p1)
}
  0x22   :  { %s1157_s2 = smov 64   ;;  %s1158_s21 = smov 4  }
  0x23   :  { %43 = dma.hbm_to_vmem [thread:$0]  %s1260_s4, 4096, %s38_s12, [#allocation6], %s1157_s2, %s1157_s2, %s1158_s21  }
  0x24   :  { %1147 = dma.done.wait [#allocation3], 4096  }
  0x25   :  { %1148 = vsyncadd [#allocation3], 4294963200 }
  0x26   :  { %1149 = dma.done.wait [#allocation6], 4096  }
  0x27   :  { %1150 = vsyncadd [#allocation6], 4294963200  ;;  %v1159_v0 = vmov 0   ;;  %v1160_v1 = vmov 1   ;;  %v1000_v2 = vld [vmem:[#allocation2 + $0x4] ss:$16 sps:$4 sm:$0xff]  }
  0x28   :  { %309 = vmatprep.mubr.bf16.mxu0 %v1159_v0  ;;  %352 = vmatprep.mubr.bf16.mxu1 %v1159_v0  ;;  %v1002_v3 = vld [vmem:[#allocation2 + $0xc] ss:$16 sps:$4 sm:$0xff]   ;;  %v1004_v4 = vld [vmem:[#allocation2] ss:$16 sps:$4 sm:$0xff]   ;;  %v1005_v5 = vld [vmem:[#allocation2 + $0x8] ss:$16 sps:$4 sm:$0xff]  }
  0x29   :  { %993 = vset.pattern.permute.xlu0 %v1160_v1  ;;  %994 = vset.pattern.permute.xlu1 %v1159_v0  ;;  %v1006_v6 = vld [vmem:[#allocation2 + $0x24] ss:$16 sps:$4 sm:$0xff]   ;;  %v1008_v7 = vld [vmem:[#allocation2 + $0x2c] ss:$16 sps:$4 sm:$0xff]   ;;  %v1010_v8 = vld [vmem:[#allocation2 + $0x20] ss:$16 sps:$4 sm:$0xff]  }
  0x2a   :  { %277 = vmatprep.subr.bf16.mxu0 %v1000_v2  ;;  %320 = vmatprep.subr.bf16.mxu1 %v1002_v3  ;;  %v1011_v9 = vld [vmem:[#allocation2 + $0x28] ss:$16 sps:$4 sm:$0xff]   ;;  %v1012_v10 = vld [vmem:[#allocation2 + $0x44] ss:$16 sps:$4 sm:$0xff]   ;;  %v1014_v11 = vld [vmem:[#allocation2 + $0x4c] ss:$16 sps:$4 sm:$0xff]  }
  0x2b   :  { %278 = vmatpush1.bf16.msra.mxu0 %v1004_v4  ;;  %321 = vmatpush1.bf16.msra.mxu1 %v1005_v5  ;;  %v1016_v12 = vld [vmem:[#allocation2 + $0x40] ss:$16 sps:$4 sm:$0xff]   ;;  %v1017_v13 = vld [vmem:[#allocation2 + $0x48] ss:$16 sps:$4 sm:$0xff]   ;;  %v1018_v14 = vld [vmem:[#allocation2 + $0x64] ss:$16 sps:$4 sm:$0xff]  }
  0x2c   :  { %279 = vmatprep.subr.bf16.mxu0 %v1006_v6  ;;  %322 = vmatprep.subr.bf16.mxu1 %v1008_v7  ;;  %v1020_v15 = vld [vmem:[#allocation2 + $0x6c] ss:$16 sps:$4 sm:$0xff]   ;;  %v1022_v16 = vld [vmem:[#allocation2 + $0x60] ss:$16 sps:$4 sm:$0xff]   ;;  %v1023_v17 = vld [vmem:[#allocation2 + $0x68] ss:$16 sps:$4 sm:$0xff]  }
  0x2d   :  { %v1024_v18 = vld [vmem:[#allocation2 + $0x84] ss:$16 sps:$4 sm:$0xff]   ;;  %v1026_v19 = vld [vmem:[#allocation2 + $0x8c] ss:$16 sps:$4 sm:$0xff]   ;;  %v1028_v20 = vld [vmem:[#allocation2 + $0x80] ss:$16 sps:$4 sm:$0xff]  }
  0x2e   :  { %v1029_v21 = vld [vmem:[#allocation2 + $0x88] ss:$16 sps:$4 sm:$0xff]   ;;  %v1030_v22 = vld [vmem:[#allocation2 + $0xa4] ss:$16 sps:$4 sm:$0xff]   ;;  %v1032_v23 = vld [vmem:[#allocation2 + $0xac] ss:$16 sps:$4 sm:$0xff]  }
  0x2f   :  { %280 = vmatpush1.bf16.msra.mxu0 %v1010_v8  ;;  %323 = vmatpush1.bf16.msra.mxu1 %v1011_v9  ;;  %v1034_v24 = vld [vmem:[#allocation2 + $0xa0] ss:$16 sps:$4 sm:$0xff]   ;;  %v1035_v25 = vld [vmem:[#allocation2 + $0xa8] ss:$16 sps:$4 sm:$0xff]   ;;  %v1036_v26 = vld [vmem:[#allocation2 + $0xc4] ss:$16 sps:$4 sm:$0xff]   ;;  %v91_v9 = vlaneseq }
  0x30   :  { %281 = vmatprep.subr.bf16.mxu0 %v1012_v10  ;;  %324 = vmatprep.subr.bf16.mxu1 %v1014_v11  ;;  %v1038_v27 = vld [vmem:[#allocation2 + $0xcc] ss:$16 sps:$4 sm:$0xff]   ;;  %v1040_v28 = vld [vmem:[#allocation2 + $0xc0] ss:$16 sps:$4 sm:$0xff]   ;;  %v1041_v29 = vld [vmem:[#allocation2 + $0xc8] ss:$16 sps:$4 sm:$0xff]  }
  0x31   :  { %v55_v30 = vld [vmem:[%s1256_s0] sm:$0xff]  ;;  %v56_v32 = vld [vmem:[%s1256_s0 + $0x8] sm:$0xff]  ;;  %vm487_vm0 = vcmask 1043456   ;;  %v1161_v38 = vmov 3   ;;  %vm482_vm1 = vcmask 31744   ;;  %v1162_v43 = vmov 2  }
  0x32   :  { %v1042_v31 = vld [vmem:[#allocation2 + $0xe4] ss:$16 sps:$4 sm:$0xff]   ;;  %373 = vperm.xlu1 %994, %v55_v30   ;;  %384 = vperm.xlu0 %993, %v55_v30   ;;  %v1044_v33 = vld [vmem:[#allocation2 + $0xec] ss:$16 sps:$4 sm:$0xff]   ;;  %v1046_v34 = vld [vmem:[#allocation2 + $0xe0] ss:$16 sps:$4 sm:$0xff]  }
  0x33   :  { %282 = vmatpush1.bf16.msra.mxu0 %v1016_v12  ;;  %325 = vmatpush1.bf16.msra.mxu1 %v1017_v13  ;;  %v1047_v35 = vld [vmem:[#allocation2 + $0xe8] ss:$16 sps:$4 sm:$0xff]   ;;  %v1048_v36 = vld [vmem:[%s1257_s1] sm:$0xff]   ;;  %v1057_v46 = vld [vmem:[#allocation5 + $0x50] sm:$0xff]   ;;  %v92_v12 = vshrl.u32 %v91_v9, 7 }
  0x34   :  { %283 = vmatprep.subr.bf16.mxu0 %v1018_v14  ;;  %326 = vmatprep.subr.bf16.mxu1 %v1020_v15  ;;  %v1049_v37 = vld [vmem:[#allocation5 + $0x40] sm:$0xff]   ;;  %v1053_v42 = vld [vmem:[#allocation5 + $0x48] sm:$0xff]   ;;  %v1058_v49 = vld [vmem:[#allocation5 + $0xd0] sm:$0xff]  }
  0x35   :  { %v481_v39 = vld [vmem:[%s1261_s5] sm:$0xf]  ;;  %v1055_v45 = vld [vmem:[#allocation5 + $0x8] sm:$0xff]   ;;  %v1059_v50 = vld [vmem:[#allocation5 + $0x10] sm:$0xff]   ;;  %v93_v13 = vsub.s32 0, %v92_v12  ;;  %v101_v14 = vsub.s32 2, %v92_v12 }
  0x36   :  { %378 = vperm.xlu1 %994, %v56_v32   ;;  %388 = vperm.xlu0 %993, %v56_v32   ;;  %v1050_v40 = vld [vmem:[#allocation5 + $0xc0] sm:$0xff]   ;;  %v1054_v47 = vld [vmem:[#allocation5 + $0xc8] sm:$0xff]   ;;  %v1061_v51 = vld [vmem:[#allocation5 + $0x58] sm:$0xff]  }
  0x37   :  { %284 = vmatpush1.bf16.msra.mxu0 %v1022_v16  ;;  %327 = vmatpush1.bf16.msra.mxu1 %v1023_v17  ;;  %v1051_v41 = vld [vmem:[#allocation5] sm:$0xff]   ;;  %v1056_v48 = vld [vmem:[#allocation5 + $0x88] sm:$0xff]   ;;  %v1063_v52 = vld [vmem:[#allocation5 + $0x18] sm:$0xff]  }
  0x38   :  { %285 = vmatprep.subr.bf16.mxu0 %v1024_v18  ;;  %328 = vmatprep.subr.bf16.mxu1 %v1026_v19  ;;  %v1052_v44 = vld [vmem:[#allocation5 + $0x80] sm:$0xff]   ;;  %v1060_v53 = vld [vmem:[#allocation5 + $0x90] sm:$0xff]   ;;  %v1062_v55 = vld [vmem:[#allocation5 + $0xd8] sm:$0xff]   ;;  %v97_v18 = vsub.s32 1, %v92_v12  ;;  %v105_v19 = vsub.s32 3, %v92_v12 }
  0x39   :  { %v1065_v54 = vld [vmem:[#allocation5 + $0x60] sm:$0xff]   ;;  %v1064_v57 = vld [vmem:[#allocation5 + $0x98] sm:$0xff]   ;;  %v1069_v60 = vld [vmem:[#allocation5 + $0x68] sm:$0xff]  }
  0x3a   :  { %996 = vset.pattern.permute.xlu1 %v1161_v38  ;;  %995 = vset.pattern.permute.xlu0 %v1161_v38  ;;  %v1067_v56 = vld [vmem:[#allocation5 + $0x20] sm:$0xff]   ;;  %v1070_v61 = vld [vmem:[#allocation5 + $0xe8] sm:$0xff]   ;;  %v1073_v0 = vld [vmem:[#allocation5 + $0x70] sm:$0xff]  }
  0x3b   :  { %286 = vmatpush1.bf16.msra.mxu0 %v1028_v20  ;;  %329 = vmatpush1.bf16.msra.mxu1 %v1029_v21  ;;  %v1066_v58 = vld [vmem:[#allocation5 + $0xe0] sm:$0xff]   ;;  %v1071_v62 = vld [vmem:[#allocation5 + $0x28] sm:$0xff]   ;;  %v1074_v1 = vld [vmem:[#allocation5 + $0xf0] sm:$0xff]  }
  0x3c   :  { %287 = vmatprep.subr.bf16.mxu0 %v1030_v22  ;;  %330 = vmatprep.subr.bf16.mxu1 %v1032_v23  ;;  %v1068_v59 = vld [vmem:[#allocation5 + $0xa0] sm:$0xff]   ;;  %v1072_v63 = vld [vmem:[#allocation5 + $0xa8] sm:$0xff]   ;;  %v1075_v2 = vld [vmem:[#allocation5 + $0x30] sm:$0xff]  }
  0x3d   :  { %408 = vperm.xlu1 %996, %v56_v32   ;;  %404 = vperm.xlu0 %995, %v55_v30   ;;  %v1076_v3 = vld [vmem:[#allocation5 + $0xb0] sm:$0xff]   ;;  %v1077_v4 = vld [vmem:[#allocation5 + $0x78] sm:$0xff]   ;;  %v89_v17 = vld [vmem:[%s1259_s3] sm:$0xf]  ;;  %s1163_s3 = smov [#allocation7]  }
  0x3e   :  { %v1078_v5 = vld [vmem:[#allocation5 + $0xf8] sm:$0xff]   ;;  %v94_v20 = vrot.slane %v89_v17, %v93_v13  ;;  %v102_v21 = vrot.slane %v89_v17, %v101_v14  ;;  %v98_v22 = vrot.slane %v89_v17, %v97_v18  ;;  %v106_v23 = vrot.slane %v89_v17, %v105_v19  ;;  %s847_s30 = sshll.u32 %s1163_s3, 4  ;;  %s848_s30 = int_to_ptr.vmem [resolvable:$true] %s847_s30 }
  0x3f   :  { %288 = vmatpush1.bf16.msra.mxu0 %v1034_v24  ;;  %331 = vmatpush1.bf16.msra.mxu1 %v1035_v25  ;;  %v1079_v6 = vld [vmem:[#allocation5 + $0x38] sm:$0xff]   ;;  %s1125_s7 = scalar_lea.vmem %s848_s30, 256  ;;  %p1130_p3 = scmp.lt.s32.totalorder %s848_s30, %s848_s30 }
  0x40   :  { %289 = vmatprep.subr.bf16.mxu0 %v1036_v26  ;;  %332 = vmatprep.subr.bf16.mxu1 %v1038_v27  ;;  %v1080_v7 = vld [vmem:[#allocation5 + $0xb8] sm:$0xff]   ;;  %p1126_p2 = scmp.ne.s32.totalorder %s848_s30, %s1125_s7  ;;  %p1131_p4 = scmp.lt.s32.totalorder %s1125_s7, %s1125_s7 }
  0x41   :  { %997 = vset.pattern.permute.xlu1 %v1162_v43  ;;  %998 = vset.pattern.permute.xlu0 %v1162_v43 }
  0x42   :  { %394 = vperm.xlu1 %997, %v55_v30   ;;  %398 = vperm.xlu0 %998, %v56_v32   ;;  %p1132_p5 = por %p1131_p4, %p1130_p3 }
  0x43   :  { %290 = vmatpush1.bf16.msra.mxu0 %v1040_v28  ;;  %333 = vmatpush1.bf16.msra.mxu1 %v1041_v29 }
  0x44   :  { %291 = vmatprep.subr.bf16.mxu0 %v1042_v31  ;;  %334 = vmatprep.subr.bf16.mxu1 %v1044_v33  ;;  %p1133_p6 = pnand %p1132_p5, %p1126_p2 }
  0x46   :  { %999 = vset.pattern.permute.xlu0 %v1161_v38 }
  0x47   :  { %292 = vmatpush1.bf16.msra.mxu0 %v1046_v34  ;;  %335 = vmatpush1.bf16.msra.mxu1 %v1047_v35 }
  0x48   :  { %975 = vmatprep.subr.msk.mxu0 %vm487_vm0, %v481_v39  ;;  %931 = vmatprep.subr.bf16.mxu1 %v1049_v37 }
  0x4a   :  { %310 = vmatmul.mubr.bf16.vlgmr.msra.gmra.mrb[0].mxu0 %v1048_v36  ;;  %353 = vmatmul.mubr.bf16.vlgmr.msra.gmra.mrb[0].mxu1 %v1048_v36 }
  0x4b   :  { %976 = vmatpush3.msk.msra.mxu0 %vm487_vm0, %v481_v39  ;;  %977 = vmatprep.mubr.msk.f32.mxu0 %vm482_vm1, %v55_v30 }
  0x4c   :  { %953 = vmatprep.subr.bf16.mxu0 %v1050_v40  ;;  %932 = vmatpush3.bf16.msra.mxu1 %v1051_v41 }
  0x4d   :  { %933 = vmatprep.subr.bf16.mxu1 %v1053_v42 }
  0x50   :  { %934 = vmatpush3.bf16.msra.mxu1 %v1055_v45 }
  0x51   :  { %935 = vmatprep.subr.bf16.mxu1 %v1057_v46 }
  0x52   :  { %978 = vmatmul.mubr.msk.f32.vlgmr.msra.gmra.mrb[4].mxu0 %vm482_vm1, %v56_v32 }
  0x53   :  { %954 = vmatpush3.bf16.msra.mxu0 %v1052_v44 }
  0x54   :  { %955 = vmatprep.subr.bf16.mxu0 %v1054_v47  ;;  %936 = vmatpush3.bf16.msra.mxu1 %v1059_v50 }
  0x55   :  { %937 = vmatprep.subr.bf16.mxu1 %v1061_v51 }
  0x57   :  { %956 = vmatpush3.bf16.msra.mxu0 %v1056_v48 }
  0x58   :  { %957 = vmatprep.subr.bf16.mxu0 %v1058_v49  ;;  %938 = vmatpush3.bf16.msra.mxu1 %v1063_v52 }
  0x59   :  { %939 = vmatprep.subr.bf16.mxu1 %v1065_v54 }
  0x5b   :  { %958 = vmatpush3.bf16.msra.mxu0 %v1060_v53 }
  0x5c   :  { %959 = vmatprep.subr.bf16.mxu0 %v1062_v55  ;;  %940 = vmatpush3.bf16.msra.mxu1 %v1067_v56 }
  0x5d   :  { %941 = vmatprep.subr.bf16.mxu1 %v1069_v60 }
  0x5f   :  { %960 = vmatpush3.bf16.msra.mxu0 %v1064_v57 }
  0x60   :  { %961 = vmatprep.subr.bf16.mxu0 %v1066_v58  ;;  %942 = vmatpush3.bf16.msra.mxu1 %v1071_v62 }
  0x61   :  { %943 = vmatprep.subr.bf16.mxu1 %v1073_v0 }
  0x63   :  { %962 = vmatpush3.bf16.msra.mxu0 %v1068_v59 }
  0x64   :  { %963 = vmatprep.subr.bf16.mxu0 %v1070_v61  ;;  %944 = vmatpush3.bf16.msra.mxu1 %v1075_v2 }
  0x65   :  { %945 = vmatprep.subr.bf16.mxu1 %v1077_v4 }
  0x67   :  { %964 = vmatpush3.bf16.msra.mxu0 %v1072_v63 }
  0x68   :  { %965 = vmatprep.subr.bf16.mxu0 %v1074_v1  ;;  %946 = vmatpush3.bf16.msra.mxu1 %v1079_v6 }
  0x6b   :  { %966 = vmatpush3.bf16.msra.mxu0 %v1076_v3 }
  0x6c   :  { %967 = vmatprep.subr.bf16.mxu0 %v1078_v5 }
  0x6f   :  { %968 = vmatpush3.bf16.msra.mxu0 %v1080_v7 }
  0xb1   :  { %v374_v8 = vpop.permute.xlu1 %373  ;;  %v385_v10 = vpop.permute.xlu0 %384 }
  0xb5   :  { %v379_v11 = vpop.permute.xlu1 %378  ;;  %v389_v16 = vpop.permute.xlu0 %388 }
  0xbc   :  { %v409_v15 = vpop.permute.xlu1 %408  ;;  %v405_v24 = vpop.permute.xlu0 %404 }
  0xc1   :  { %v395_v25 = vpop.permute.xlu1 %394  ;;  %v399_v46 = vpop.permute.xlu0 %398 }
 0x11d   :  { %v311_v26 = vpop.f32.mrb[0].mxu0  ;;  %v354_v27 = vpop.f32.mrb[0].mxu1 }
 0x11e   :  { %v312_v28 = vadd.f32 %v311_v26, %v94_v20  ;;  %v355_v29 = vadd.f32 %v354_v27, %v102_v21  ;;  %v313_v30 = vpop.f32.mrb[1].mxu0  ;;  %v356_v31 = vpop.f32.mrb[1].mxu1 }
 0x11f   :  { %v314_v32 = vadd.f32 %v313_v30, %v98_v22  ;;  %v357_v33 = vadd.f32 %v356_v31, %v106_v23  ;;  %v315_v34 = vpop.f32.mrb[2].mxu0  ;;  %v358_v35 = vpop.f32.mrb[2].mxu1 }
 0x120   :  { %v363_v36 = vmax.f32 %v312_v28, 0.0  ;;  %v365_v37 = vmax.f32 %v355_v29, 0.0  ;;  %v316_v38 = vadd.f32 %v315_v34, %v94_v20  ;;  %v359_v39 = vadd.f32 %v358_v35, %v102_v21  ;;  %v317_v40 = vpop.f32.mrb[3].mxu0  ;;  %v360_v41 = vpop.f32.mrb[3].mxu1 }
 0x121   :  { %v364_v42 = vmax.f32 %v314_v32, 0.0  ;;  %v366_v43 = vmax.f32 %v357_v33, 0.0  ;;  %v318_v44 = vadd.f32 %v317_v40, %v98_v22  ;;  %v361_v45 = vadd.f32 %v360_v41, %v106_v23 }
 0x122   :  { %v367_v47 = vmax.f32 %v316_v38, 0.0  ;;  %v369_v48 = vmax.f32 %v359_v39, 0.0  ;;  %v401_v49 = vmul.f32 %v395_v25, %v365_v37  ;;  %v381_v52 = vmul.f32 %v374_v8, %v363_v36 }
 0x123   :  { %v368_v50 = vmax.f32 %v318_v44, 0.0  ;;  %v370_v51 = vmax.f32 %v361_v45, 0.0  ;;  %v391_v55 = vmul.f32 %v385_v10, %v364_v42  ;;  %v411_v56 = vmul.f32 %v405_v24, %v366_v43 }
 0x124   :  { %v382_v53 = vmul.f32 %v379_v11, %v367_v47  ;;  %v402_v54 = vmul.f32 %v399_v46, %v369_v48 }
 0x125   :  { %v392_v57 = vmul.f32 %v389_v16, %v368_v50  ;;  %v412_v58 = vmul.f32 %v409_v15, %v370_v51  ;;  %v979_v59 = vpop.f32.mrb[4].mxu0 }
 0x126   :  { %v413_v60 = vpack.c.bf16 %v382_v53, %v381_v52  ;;  %v415_v61 = vpack.c.bf16 %v402_v54, %v401_v49  ;;  %v557_v62 = vpop.f32.mrb[5].mxu0 }
 0x127   :  { %v414_v63 = vpack.c.bf16 %v392_v57, %v391_v55  ;;  %v416_v0 = vpack.c.bf16 %v412_v58, %v411_v56 }
 0x129   :  { %790 = vmatprep.mubr.bf16.mxu1 %v414_v63  ;;  %831 = vmatprep.mubr.bf16.mxu0 %v416_v0 }
 0x12a   :  { %791 = vmatmul.mubr.bf16.vlgmr.msra.gmra.mrb[4].mxu1 %v413_v60  ;;  %832 = vmatmul.mubr.bf16.vlgmr.msra.gmra.mrb[8].mxu0 %v415_v61 }
 0x1fd   :  { %v947_v1 = vpop.f32.mrb[4].mxu1  ;;  %v969_v2 = vpop.f32.mrb[8].mxu0 }
 0x1fe   :  { %v948_v3 = vpop.f32.mrb[5].mxu1  ;;  %v970_v4 = vpop.f32.mrb[9].mxu0 }
 0x1ff   :  { %v949_v5 = vadd.f32 %v948_v3, %v947_v1  ;;  %v971_v6 = vadd.f32 %v970_v4, %v969_v2  ;;  %v950_v7 = vpop.f32.mrb[6].mxu1  ;;  %v972_v8 = vpop.f32.mrb[10].mxu0 }
 0x200   :  { %v951_v9 = vpop.f32.mrb[7].mxu1  ;;  %v973_v10 = vpop.f32.mrb[11].mxu0 }
 0x201   :  { %v793_v11 = vadd.f32 %v949_v5, %v557_v62  ;;  %v952_v12 = vadd.f32 %v951_v9, %v950_v7  ;;  %v974_v13 = vadd.f32 %v973_v10, %v972_v8 }
 0x203   :  { %v834_v14 = vadd.f32 %v971_v6, %v793_v11  ;;  %v796_v15 = vadd.f32 %v979_v59, %v952_v12 }
 0x205   :  { %840 = vst [vmem:[#allocation7] sm:$0xff] %v834_v14  ;;  %v837_v16 = vadd.f32 %v974_v13, %v796_v15 }
 0x207   :  { %841 = vst [vmem:[#allocation7 + $0x8] sm:$0xff] %v837_v16 }
 0x208   :  { %1136 = shalt.err (!%p1133_p6)
}
 0x209   :  { %s1137_s10 = scalar_lea.hbm %s1262_s6, 256 }
 0x20a   :  { %p1138_p7 = scmp.ne.s32.totalorder %s1262_s6, %s1137_s10  ;;  %p1141_p8 = scmp.lt.u32.totalorder %s1137_s10, %s1262_s6 }
 0x20c   :  { %p1143_p9 = pnand %p1141_p8, %p1138_p7 }
 0x20e   :  { %1146 = shalt.err (!%p1143_p9)
}
 0x20f   :  { %s1164_s15 = smov 128   ;;  %s1165_s16 = smov 8  }
 0x210   :  { %853 = dma.vmem_to_hbm [thread:$0]  %s848_s30, 256, %s1262_s6, [#allocation4], %s1164_s15, %s1164_s15, %s1165_s16  }
 0x211   :  { %1151 = dma.done.wait [#allocation4], 256  }
 0x212   :  { %1152 = vsyncadd [#allocation4], 4294967040 }
 0x213   :  { %857 = vsyncpa [#allocation3], 1 }
 0x214   :  { %858 = vsyncpa [#allocation6], 1 }
 0x215   :  { %859 = vsyncpa [#allocation4], 1 }

</bundles_post_ra>
